<compile_context>
chip_gen: v5e
topology: v5e:2x2
jax: 0.10.0
libtpu: 0.0.40
codegen_flags: <defaults>
</compile_context>

<pallas_src>
import functools
import math

import jax
import jax.numpy as jnp
from jax.experimental import pallas as pl
from jax.experimental.pallas import tpu as pltpu


# ---------------------------------------------------------------------------
# column planning helpers
# ---------------------------------------------------------------------------

def _plan_columns(width, max_col_block):
    """Pad width to a multiple of 128 and pick a column block size."""
    width_pad = ((width + 127) // 128) * 128
    cap = min(width_pad, max(128, (max_col_block // 128) * 128))
    if width_pad >= 256:
        # ensure >= 2 column tiles so the "parallel" axis can shard across
        # v7x's two TensorCores (harmless on single-TC v5e/v6e).
        cap = min(cap, width_pad // 2)
    blk = max((cap // 128) * 128, 128)
    while width_pad % blk != 0:
        blk -= 128
    return width_pad, blk, (width_pad // blk,)


def _build_periodic_bias(bias2d, cols, width_pad, blk):
    """Bias repeats with period `cols` along the dense column axis.

    Returns (bias_array, resident).  When blk % cols == 0 a single (rows, blk)
    tile is returned and kept resident; otherwise a full-width slab is built
    once and streamed column-tiled.
    """
    bias2d = bias2d.astype(jnp.float32)
    if blk % cols == 0:
        return jnp.tile(bias2d, (1, blk // cols)), True
    reps = -(-width_pad // cols)
    return jnp.tile(bias2d, (1, reps))[:, :width_pad], False


def _pad_cols(a, width_pad):
    pad = width_pad - a.shape[1]
    if pad:
        a = jnp.pad(a, ((0, 0), (0, pad)))
    return a


def _stable_sigmoid(x):
    # exact sigmoid, numerically stable, single EUP tanh
    return 0.5 * (jnp.tanh(0.5 * x) + 1.0)


# ---------------------------------------------------------------------------
# single gate: activation(W @ x + U @ h + bias)
# ---------------------------------------------------------------------------

def _gate_kernel(wu_ref, x_ref, h_ref, b_ref, o_ref, *, activation, mxu_dtype):
    # Concatenate the two activation tiles in VMEM (sublane-aligned) and run a
    # single fused MXU pass against the resident [W | U] weight.
    xh = jnp.concatenate([x_ref[...], h_ref[...]], axis=0).astype(mxu_dtype)
    pre = jnp.dot(wu_ref[...], xh, preferred_element_type=jnp.float32)
    pre = pre + b_ref[...]
    if activation == "sigmoid":
        act = _stable_sigmoid(pre)
    elif activation == "tanh":
        act = jnp.tanh(pre)
    else:
        raise ValueError(f"unsupported activation: {activation}")
    o_ref[...] = act.astype(o_ref.dtype)


def mat_gru_gate(W, U, bias, x, hidden, *, activation="sigmoid",
                 mxu_dtype=jnp.bfloat16, out_dtype=None,
                 max_col_block=2048, wu=None):
    """activation(W @ x + U @ hidden + bias).

    x / hidden may be:
      * (rows, cols)            -- single gate evaluation (the spec module),
      * (rows, k*cols)          -- a lane-dense horizontal stack of k
                                   independent evaluations (preferred layout:
                                   no wrapper transposes),
      * (T, rows, cols)         -- a batch; laid out densely internally and
                                   reshaped back on return.
    Pass a pre-fused bf16 [W | U] via `wu=` to guarantee the weight concat /
    cast is hoisted out of a per-timestep scan.
    """
    if activation not in ("sigmoid", "tanh"):
        raise ValueError(f"unsupported activation: {activation}")
    rows, cols = bias.shape

    batched_3d = (x.ndim == 3)
    if batched_3d:
        T = x.shape[0]
        assert x.shape == (T, rows, cols) and hidden.shape == (T, rows, cols)
        x2 = jnp.transpose(x, (1, 0, 2)).reshape(rows, T * cols)
        h2 = jnp.transpose(hidden, (1, 0, 2)).reshape(rows, T * cols)
    else:
        assert x.shape[0] == rows and hidden.shape == x.shape
        x2, h2 = x, hidden
    width = x2.shape[1]
    assert width % cols == 0, "2-D inputs must stack (rows, cols) panels"
    assert W.shape == (rows, rows) and U.shape == (rows, rows)

    if out_dtype is None:
        out_dtype = x.dtype

    if wu is None:
        wu = jnp.concatenate([W, U], axis=1)          # (rows, 2*rows), static
    wu = wu.astype(mxu_dtype)

    width_pad, blk, grid = _plan_columns(width, max_col_block)
    x2 = _pad_cols(x2, width_pad)
    h2 = _pad_cols(h2, width_pad)
    bias_arr, bias_resident = _build_periodic_bias(bias, cols, width_pad, blk)
    bias_map = (lambda j: (0, 0)) if bias_resident else (lambda j: (0, j))

    act_itemsize = jnp.dtype(x2.dtype).itemsize
    cost = pl.CostEstimate(
        flops=2 * rows * (2 * rows) * width_pad,
        transcendentals=rows * width_pad,
        bytes_accessed=(wu.size * jnp.dtype(mxu_dtype).itemsize
                        + (x2.size + h2.size) * act_itemsize
                        + bias_arr.size * 4
                        + rows * width_pad * jnp.dtype(out_dtype).itemsize),
    )

    kernel = functools.partial(_gate_kernel, activation=activation,
                               mxu_dtype=mxu_dtype)
    out = pl.pallas_call(
        kernel,
        out_shape=jax.ShapeDtypeStruct((rows, width_pad), out_dtype),
        grid=grid,
        in_specs=[
            pl.BlockSpec((rows, 2 * rows), lambda j: (0, 0)),   # [W|U] resident
            pl.BlockSpec((rows, blk), lambda j: (0, j)),        # x column tile
            pl.BlockSpec((rows, blk), lambda j: (0, j)),        # h column tile
            pl.BlockSpec((rows, blk), bias_map),                # bias (resident if periodic)
        ],
        out_specs=pl.BlockSpec((rows, blk), lambda j: (0, j)),
        compiler_params=pltpu.CompilerParams(
            dimension_semantics=("parallel",)),
        cost_estimate=cost,
    )(wu, x2, h2, bias_arr)

    if width_pad != width:
        out = out[:, :width]
    if batched_3d:
        out = out.reshape(rows, T, cols).transpose(1, 0, 2)
    return out


# ---------------------------------------------------------------------------
# fused mat_GRU_cell: update / reset / htilda gates + hidden update in one call
# ---------------------------------------------------------------------------

def _cell_kernel(wx_ref, uq_ref, uh_ref, b_ref, x_ref, q_ref, o_ref, *,
                 rows, mxu_dtype):
    r = rows
    q32 = q_ref[...]                                   # prev_Q, f32
    x = x_ref[...].astype(mxu_dtype)
    q = q32.astype(mxu_dtype)
    # One MXU pass for all three W-gates, one for the two U-gates sharing prev_Q.
    pw = jnp.dot(wx_ref[...], x, preferred_element_type=jnp.float32)   # (3r, blk)
    pu = jnp.dot(uq_ref[...], q, preferred_element_type=jnp.float32)   # (2r, blk)
    b = b_ref[...]
    upd = _stable_sigmoid(pw[0:r] + pu[0:r] + b[0:r])
    rst = _stable_sigmoid(pw[r:2 * r] + pu[r:2 * r] + b[r:2 * r])
    hcap_in = (rst * q32).astype(mxu_dtype)
    pre_h = pw[2 * r:3 * r] + b[2 * r:3 * r] + jnp.dot(
        uh_ref[...], hcap_in, preferred_element_type=jnp.float32)
    htl = jnp.tanh(pre_h)
    new_q = q32 + upd * (htl - q32)                    # (1-u)*q + u*htilde
    o_ref[...] = new_q.astype(o_ref.dtype)


def mat_gru_cell(update_params, reset_params, htilda_params, prev_Q, z_topk, *,
                 mxu_dtype=jnp.bfloat16, out_dtype=None, max_col_block=2048):
    """One pallas_call for the whole mat_GRU_cell step (x / prev_Q read once)."""
    Wu, Uu, bu = update_params
    Wr, Ur, br = reset_params
    Wh, Uh, bh = htilda_params
    rows, cols = bu.shape
    assert prev_Q.shape == z_topk.shape and prev_Q.shape[0] == rows
    width = prev_Q.shape[1]
    assert width % cols == 0

    if out_dtype is None:
        out_dtype = prev_Q.dtype

    wx = jnp.concatenate([Wu, Wr, Wh], axis=0).astype(mxu_dtype)   # (3r, r)
    uq = jnp.concatenate([Uu, Ur], axis=0).astype(mxu_dtype)       # (2r, r)
    uh = Uh.astype(mxu_dtype)                                      # (r, r)
    bstack = jnp.concatenate([bu, br, bh], axis=0)                 # (3r, cols)

    width_pad, blk, grid = _plan_columns(width, max_col_block)
    x2 = _pad_cols(z_topk, width_pad)
    q2 = _pad_cols(prev_Q, width_pad)
    bias_arr, bias_resident = _build_periodic_bias(bstack, cols, width_pad, blk)
    bias_map = (lambda j: (0, 0)) if bias_resident else (lambda j: (0, j))

    act_itemsize = jnp.dtype(x2.dtype).itemsize
    cost = pl.CostEstimate(
        flops=2 * rows * rows * width_pad * 6,
        transcendentals=3 * rows * width_pad,
        bytes_accessed=((wx.size + uq.size + uh.size) * jnp.dtype(mxu_dtype).itemsize
                        + (x2.size + q2.size) * act_itemsize
                        + bias_arr.size * 4
                        + rows * width_pad * jnp.dtype(out_dtype).itemsize),
    )

    kernel = functools.partial(_cell_kernel, rows=rows, mxu_dtype=mxu_dtype)
    out = pl.pallas_call(
        kernel,
        out_shape=jax.ShapeDtypeStruct((rows, width_pad), out_dtype),
        grid=grid,
        in_specs=[
            pl.BlockSpec((3 * rows, rows), lambda j: (0, 0)),   # W stack, resident
            pl.BlockSpec((2 * rows, rows), lambda j: (0, 0)),   # U_upd/U_rst stack
            pl.BlockSpec((rows, rows), lambda j: (0, 0)),       # U_htilda
            pl.BlockSpec((3 * rows, blk), bias_map),            # bias stack
            pl.BlockSpec((rows, blk), lambda j: (0, j)),        # z_topk tile
            pl.BlockSpec((rows, blk), lambda j: (0, j)),        # prev_Q tile
        ],
        out_specs=pl.BlockSpec((rows, blk), lambda j: (0, j)),
        compiler_params=pltpu.CompilerParams(
            dimension_semantics=("parallel",)),
        cost_estimate=cost,
    )(wx, uq, uh, bias_arr, x2, q2)

    if width_pad != width:
        out = out[:, :width]
    return out


# ---------------------------------------------------------------------------
# self-test
# ---------------------------------------------------------------------------

def _reset_param(key, rows_out, cols_in):
    # Matches PyTorch reset_param: uniform(-stdv, stdv), stdv = 1/sqrt(cols_in)
    stdv = 1.0 / math.sqrt(cols_in)
    return jax.random.uniform(key, (rows_out, cols_in), dtype=jnp.float32,
                              minval=-stdv, maxval=stdv)


if __name__ == "__main__":
    rows, cols = 32, 16  # small shapes consistent with the module
    key = jax.random.PRNGKey(0)
    ks = jax.random.split(key, 16)

    W = _reset_param(ks[0], rows, rows)
    U = _reset_param(ks[1], rows, rows)
    # Module inits bias to zeros; a small nonzero bias exercises the bias path.
    bias = 0.1 * jax.random.normal(ks[2], (rows, cols), dtype=jnp.float32)

    x = jax.random.normal(ks[3], (rows, cols), dtype=jnp.float32)
    h = jax.random.normal(ks[4], (rows, cols), dtype=jnp.float32)
    ref = jax.nn.sigmoid(W @ x + U @ h + bias)

    # 1) single gate, strict f32 MXU operands
    out_f32 = jax.block_until_ready(
        mat_gru_gate(W, U, bias, x, h, activation="sigmoid",
                     mxu_dtype=jnp.float32))
    assert out_f32.shape == (rows, cols)
    assert jnp.allclose(out_f32, ref, atol=1e-2, rtol=1e-2), "f32 gate mismatch"

    # 2) single gate, default bf16 MXU operands
    out_bf16 = jax.block_until_ready(
        mat_gru_gate(W, U, bias, x, h, activation="sigmoid"))
    assert out_bf16.shape == (rows, cols)
    assert jnp.allclose(out_bf16, ref, atol=3e-2, rtol=3e-2), "bf16 gate mismatch"

    # 3) batched T=8 (lane-dense width = T*cols = 128), tanh
    T = 8
    xb = jax.random.normal(ks[5], (T, rows, cols), dtype=jnp.float32)
    hb = jax.random.normal(ks[6], (T, rows, cols), dtype=jnp.float32)
    ref_b = jnp.tanh(jnp.einsum("ij,tjc->tic", W, xb)
                     + jnp.einsum("ij,tjc->tic", U, hb) + bias[None])
    out_b = jax.block_until_ready(
        mat_gru_gate(W, U, bias, xb, hb, activation="tanh"))
    assert out_b.shape == (T, rows, cols)
    assert jnp.allclose(out_b, ref_b, atol=3e-2, rtol=3e-2), "batched gate mismatch"

    # 3b) same data through the preferred dense (rows, T*cols) layout
    xd = jnp.transpose(xb, (1, 0, 2)).reshape(rows, T * cols)
    hd = jnp.transpose(hb, (1, 0, 2)).reshape(rows, T * cols)
    out_d = jax.block_until_ready(
        mat_gru_gate(W, U, bias, xd, hd, activation="tanh"))
    ref_d = jnp.transpose(ref_b, (1, 0, 2)).reshape(rows, T * cols)
    assert jnp.allclose(out_d, ref_d, atol=3e-2, rtol=3e-2), "dense gate mismatch"

    # 4) fused full mat_GRU_cell step (review's top optimization)
    Wr_, Ur_ = _reset_param(ks[7], rows, rows), _reset_param(ks[8], rows, rows)
    Wh_, Uh_ = _reset_param(ks[9], rows, rows), _reset_param(ks[10], rows, rows)
    br_ = 0.1 * jax.random.normal(ks[11], (rows, cols), dtype=jnp.float32)
    bh_ = 0.1 * jax.random.normal(ks[12], (rows, cols), dtype=jnp.float32)
    prev_Q = jax.random.normal(ks[13], (rows, cols), dtype=jnp.float32)
    z_topk = jax.random.normal(ks[14], (rows, cols), dtype=jnp.float32)

    upd_r = jax.nn.sigmoid(W @ z_topk + U @ prev_Q + bias)
    rst_r = jax.nn.sigmoid(Wr_ @ z_topk + Ur_ @ prev_Q + br_)
    hcap_r = jnp.tanh(Wh_ @ z_topk + Uh_ @ (rst_r * prev_Q) + bh_)
    ref_cell = (1.0 - upd_r) * prev_Q + upd_r * hcap_r

    out_cell = jax.block_until_ready(
        mat_gru_cell((W, U, bias), (Wr_, Ur_, br_), (Wh_, Uh_, bh_),
                     prev_Q, z_topk))
    assert out_cell.shape == (rows, cols)
    assert jnp.allclose(out_cell, ref_cell, atol=6e-2, rtol=6e-2), "cell mismatch"

    print("KERNEL_OK")
</pallas_src>

<mosaic_0001>
module attributes {stable_mosaic.version = 11 : i64} {
  func.func @_gate_kernel(%arg0: i32, %arg1: memref<32x64xf32, #tpu.memory_space<vmem>>, %arg2: memref<32x128xf32, #tpu.memory_space<vmem>>, %arg3: memref<32x128xf32, #tpu.memory_space<vmem>>, %arg4: memref<32x128xf32, #tpu.memory_space<vmem>>, %arg5: memref<32x128xf32, #tpu.memory_space<vmem>>) attributes {dimension_semantics = [#tpu.dimension_semantics<parallel>], iteration_bounds = array<i64: 1>, scalar_prefetch = 0 : i64, scratch_operands = 0 : i64, tpu.core_type = #tpu.core_type<tc>, window_params = [{pipeline_mode = #tpu.pipeline_mode<synchronous>, transform_indices = @transform_0, window_bounds = array<i64: 32, 64>}, {transform_indices = @transform_1, window_bounds = array<i64: 32, 128>}, {transform_indices = @transform_2, window_bounds = array<i64: 32, 128>}, {pipeline_mode = #tpu.pipeline_mode<synchronous>, transform_indices = @transform_3, window_bounds = array<i64: 32, 128>}, {transform_indices = @transform_4, window_bounds = array<i64: 32, 128>}]} {
    %c0 = arith.constant 0 : index
    %c0_0 = arith.constant 0 : index
    %0 = vector.load %arg2[%c0, %c0_0] : memref<32x128xf32, #tpu.memory_space<vmem>>, vector<32x128xf32>
    %c0_1 = arith.constant 0 : index
    %c0_2 = arith.constant 0 : index
    %1 = vector.load %arg3[%c0_1, %c0_2] : memref<32x128xf32, #tpu.memory_space<vmem>>, vector<32x128xf32>
    %2 = tpu.concatenate %0, %1 in 0 : vector<32x128xf32>, vector<32x128xf32> -> vector<64x128xf32>
    %c0_3 = arith.constant 0 : index
    %c0_4 = arith.constant 0 : index
    %3 = vector.load %arg1[%c0_3, %c0_4] : memref<32x64xf32, #tpu.memory_space<vmem>>, vector<32x64xf32>
    %cst = arith.constant dense<0.000000e+00> : vector<32x128xf32>
    %4 = tpu.matmul %3, %2, %cst {dimension_numbers = #tpu.dot_dimension_numbers<[1], [0], [0], [1], [0, 0, 1, 1], [], []>} : vector<32x64xf32>, vector<64x128xf32>, vector<32x128xf32> -> vector<32x128xf32>
    %c0_5 = arith.constant 0 : index
    %c0_6 = arith.constant 0 : index
    %5 = vector.load %arg4[%c0_5, %c0_6] : memref<32x128xf32, #tpu.memory_space<vmem>>, vector<32x128xf32>
    %6 = arith.addf %4, %5 : vector<32x128xf32>
    %cst_7 = arith.constant 5.000000e-01 : f32
    %7 = vector.broadcast %cst_7 : f32 to vector<32x128xf32>
    %8 = arith.mulf %7, %6 : vector<32x128xf32>
    %9 = math.tanh %8 : vector<32x128xf32>
    %cst_8 = arith.constant 1.000000e+00 : f32
    %10 = vector.broadcast %cst_8 : f32 to vector<32x128xf32>
    %11 = arith.addf %9, %10 : vector<32x128xf32>
    %cst_9 = arith.constant 5.000000e-01 : f32
    %12 = vector.broadcast %cst_9 : f32 to vector<32x128xf32>
    %13 = arith.mulf %12, %11 : vector<32x128xf32>
    %c0_10 = arith.constant 0 : index
    %c0_11 = arith.constant 0 : index
    %14 = vector.load %arg5[%c0_10, %c0_11] : memref<32x128xf32, #tpu.memory_space<vmem>>, vector<32x128xf32>
    tpu.vector_store %arg5[%c0_10, %c0_11], %13 {strides = array<i32>} : memref<32x128xf32, #tpu.memory_space<vmem>>, vector<32x128xf32>,
    return
  }
  func.func @transform_0(%arg0: i32) -> (i32, i32) {
    %c0_i32 = arith.constant 0 : i32
    %c0_i32_0 = arith.constant 0 : i32
    %c0_i32_1 = arith.constant 0 : i32
    return %c0_i32, %c0_i32_0 : i32, i32
  }
  func.func @transform_1(%arg0: i32) -> (i32, i32) {
    %c0_i32 = arith.constant 0 : i32
    %c0_i32_0 = arith.constant 0 : i32
    return %c0_i32, %arg0 : i32, i32
  }
  func.func @transform_2(%arg0: i32) -> (i32, i32) {
    %c0_i32 = arith.constant 0 : i32
    %c0_i32_0 = arith.constant 0 : i32
    return %c0_i32, %arg0 : i32, i32
  }
  func.func @transform_3(%arg0: i32) -> (i32, i32) {
    %c0_i32 = arith.constant 0 : i32
    %c0_i32_0 = arith.constant 0 : i32
    %c0_i32_1 = arith.constant 0 : i32
    return %c0_i32, %c0_i32_0 : i32, i32
  }
  func.func @transform_4(%arg0: i32) -> (i32, i32) {
    %c0_i32 = arith.constant 0 : i32
    %c0_i32_0 = arith.constant 0 : i32
    return %c0_i32, %arg0 : i32, i32
  }
}

</mosaic_0001>

<bundles_post_ra>
// kernel: tpu_custom_call.1
= control target key start
LH: loop header
LB: loop body
LE: loop exit
PB: predicated region body
PF: predicated region fallthrough
CT: control target
= control target key end

     0   :  { %9 = vsyncpa [#allocation3], 0  ;;  %s413_s0 = inlined_call_operand.hbm [shape: f32[32,64], index: 0, kind: input, shape index: {}]   ;;  %s414_s1 = inlined_call_operand.hbm [shape: f32[32,128], index: 1, kind: input, shape index: {}]   ;;  %s415_s2 = inlined_call_operand.hbm [shape: f32[32,128], index: 2, kind: input, shape index: {}]   ;;  %s416_s3 = inlined_call_operand.hbm [shape: f32[32,128], index: 3, kind: input, shape index: {}]   ;;  %s417_s4 = inlined_call_operand.hbm [shape: f32[32,128], index: 4, kind: output, shape index: {}]  }
   0x1   :  { %10 = vsyncpa [#allocation6], 0 }
   0x2   :  { %11 = vsyncpa [#allocation9], 0 }
   0x3   :  { %12 = vsyncpa [#allocation4], 0  ;;  %s30_s17 = sshll.u32 %s414_s1, 4  ;;  %s351_s18 = smov [#allocation5]   ;;  %s31_s17 = int_to_ptr.hbm [resolvable:$true] %s30_s17 }
   0x4   :  { %s32_s19 = sshll.u32 %s351_s18, 4  ;;  %s17_s22 = sshll.u32 %s413_s0, 4  ;;  %s33_s19 = int_to_ptr.vmem [resolvable:$true] %s32_s19  ;;  %s18_s22 = int_to_ptr.hbm [resolvable:$true] %s17_s22 }
   0x5   :  { %s352_s23 = smov 128   ;;  %s353_s24 = smov 8  }
   0x6   :  { %38 = dma.hbm_to_vmem [thread:$0]  %s31_s17, 512, %s33_s19, [#allocation6], %s352_s23, %s352_s23, %s353_s24  }
   0x7   :  { %s354_s25 = smov [#allocation2]   ;;  %s43_s1 = sshll.u32 %s415_s2, 4  ;;  %s44_s1 = int_to_ptr.hbm [resolvable:$true] %s43_s1 }
   0x8   :  { %s19_s26 = sshll.u32 %s354_s25, 4  ;;  %s56_s30 = sshll.u32 %s416_s3, 4  ;;  %s20_s26 = int_to_ptr.vmem [resolvable:$true] %s19_s26  ;;  %s57_s30 = int_to_ptr.hbm [resolvable:$true] %s56_s30 }
   0x9   :  { %25 = dma.hbm_to_vmem [thread:$0]  %s18_s22, 512, %s20_s26, [#allocation3], %s352_s23, %s352_s23, %s353_s24  }
   0xa   :  { %s355_s5 = smov [#allocation7]   ;;  %s356_s7 = smov [#allocation8]  }
   0xb   :  { %s45_s6 = sshll.u32 %s355_s5, 4  ;;  %s58_s2 = sshll.u32 %s356_s7, 4  ;;  %s46_s6 = int_to_ptr.vmem [resolvable:$true] %s45_s6  ;;  %s59_s2 = int_to_ptr.vmem [resolvable:$true] %s58_s2 }
   0xc   :  { %51 = dma.hbm_to_vmem [thread:$0]  %s44_s1, 512, %s46_s6, [#allocation6], %s352_s23, %s352_s23, %s353_s24  }
   0xd   :  { %64 = dma.hbm_to_vmem [thread:$0]  %s57_s30, 512, %s59_s2, [#allocation9], %s352_s23, %s352_s23, %s353_s24  }
   0xe   :  { %343 = dma.done.wait [#allocation3], 512  }
   0xf   :  { %344 = vsyncadd [#allocation3], 4294966784 }
  0x10   :  { %345 = dma.done.wait [#allocation6], 1024  }
  0x11   :  { %346 = vsyncadd [#allocation6], 4294966272 }
  0x12   :  { %347 = dma.done.wait [#allocation9], 512  }
  0x13   :  { %348 = vsyncadd [#allocation9], 4294966784  ;;  %v88_v0 = vld [vmem:[#allocation7 + $0x18] sm:$0xff]  ;;  %v87_v1 = vld [vmem:[#allocation7 + $0x10] sm:$0xff]  ;;  %vm97_vm0 = vcmask 523264   ;;  %s357_s3 = smov [#allocation10]  }
  0x14   :  { %185 = vmatpush.msra.mxu2 %v88_v0  ;;  %186 = vmatpush.msra.mxu3 %v88_v0  ;;  %v86_v2 = vld [vmem:[#allocation7 + $0x8] sm:$0xff]  ;;  %v85_v3 = vld [vmem:[#allocation7] sm:$0xff]  ;;  %v84_v4 = vld [vmem:[#allocation5 + $0x18] sm:$0xff]  ;;  %s163_s8 = sshll.u32 %s357_s3, 4  ;;  %s165_s11 = sshll.u32 %s417_s4, 4  ;;  %s164_s8 = int_to_ptr.vmem [resolvable:$true] %s163_s8  ;;  %s166_s11 = int_to_ptr.hbm [resolvable:$true] %s165_s11 }
  0x15   :  { %118 = vmatpush.msra.mxu0 %v88_v0  ;;  %184 = vmatpush.msra.mxu1 %v88_v0  ;;  %v83_v5 = vld [vmem:[#allocation5 + $0x10] sm:$0xff]  ;;  %v82_v6 = vld [vmem:[#allocation5 + $0x8] sm:$0xff]  ;;  %v81_v7 = vld [vmem:[#allocation5] sm:$0xff] }
  0x16   :  { %188 = vmatpush.msra.mxu2 %v87_v1  ;;  %189 = vmatpush.msra.mxu3 %v87_v1  ;;  %v91_v8 = vld [vmem:[#allocation2 + $0x10] sm:$0xff]  ;;  %v92_v9 = vld [vmem:[#allocation2 + $0x18] sm:$0xff]  ;;  %v89_v10 = vld [vmem:[#allocation2] sm:$0xff] }
  0x17   :  { %119 = vmatpush.msra.mxu0 %v87_v1  ;;  %187 = vmatpush.msra.mxu1 %v87_v1  ;;  %v90_v11 = vld [vmem:[#allocation2 + $0x8] sm:$0xff]  ;;  %v93_v12 = vld [vmem:[#allocation8] sm:$0xff]  ;;  %v95_v18 = vld [vmem:[#allocation8 + $0x10] sm:$0xff] }
  0x18   :  { %191 = vmatpush.msra.mxu2 %v86_v2  ;;  %192 = vmatpush.msra.mxu3 %v86_v2  ;;  %v94_v13 = vld [vmem:[#allocation8 + $0x8] sm:$0xff]  ;;  %v96_v19 = vld [vmem:[#allocation8 + $0x18] sm:$0xff] }
  0x19   :  { %120 = vmatpush.msra.mxu0 %v86_v2  ;;  %190 = vmatpush.msra.mxu1 %v86_v2 }
  0x1a   :  { %194 = vmatpush.msra.mxu2 %v85_v3  ;;  %195 = vmatpush.msra.mxu3 %v85_v3 }
  0x1b   :  { %121 = vmatpush.msra.mxu0 %v85_v3  ;;  %193 = vmatpush.msra.mxu1 %v85_v3 }
  0x1c   :  { %197 = vmatpush.msra.mxu2 %v84_v4  ;;  %198 = vmatpush.msra.mxu3 %v84_v4 }
  0x1d   :  { %122 = vmatpush.msra.mxu0 %v84_v4  ;;  %196 = vmatpush.msra.mxu1 %v84_v4 }
  0x1e   :  { %200 = vmatpush.msra.mxu2 %v83_v5  ;;  %201 = vmatpush.msra.mxu3 %v83_v5 }
  0x1f   :  { %123 = vmatpush.msra.mxu0 %v83_v5  ;;  %199 = vmatpush.msra.mxu1 %v83_v5 }
  0x20   :  { %203 = vmatpush.msra.mxu2 %v82_v6  ;;  %204 = vmatpush.msra.mxu3 %v82_v6 }
  0x21   :  { %124 = vmatpush.msra.mxu0 %v82_v6  ;;  %202 = vmatpush.msra.mxu1 %v82_v6 }
  0x22   :  { %206 = vmatpush.msra.mxu2 %v81_v7  ;;  %207 = vmatpush.msra.mxu3 %v81_v7 }
  0x23   :  { %182 = vmatmul.msk.f32.vlgmr.msra.gmra.mxu2 %vm97_vm0, %v91_v8  ;;  %183 = vmatmul.msk.f32.vlgmr.msra.gmra.mxu3 %vm97_vm0, %v92_v9 }
  0x24   :  { %125 = vmatpush.msra.mxu0 %v81_v7  ;;  %205 = vmatpush.msra.mxu1 %v81_v7 }
  0x25   :  { %180 = vmatmul.msk.f32.vlgmr.msra.gmra.mxu0 %vm97_vm0, %v89_v10  ;;  %181 = vmatmul.msk.f32.vlgmr.msra.gmra.mxu1 %vm97_vm0, %v90_v11 }
  0xa2   :  { %v127_v14 = vpop.f32.mrf.mxu0  ;;  %v130_v15 = vpop.f32.mrf.mxu1 }
  0xa3   :  { %v128_v16 = vadd.f32 %v127_v14, %v93_v12  ;;  %v131_v17 = vadd.f32 %v130_v15, %v94_v13 }
  0xa5   :  { %v139_v20 = vmul.f32 0.5, %v128_v16  ;;  %v140_v21 = vmul.f32 0.5, %v131_v17 }
  0xa6   :  { %v133_v22 = vpop.f32.mrf.mxu2  ;;  %v136_v23 = vpop.f32.mrf.mxu3 }
  0xa7   :  { %215 = vtanh.f32 %v139_v20  ;;  %v134_v24 = vadd.f32 %v133_v22, %v95_v18  ;;  %v137_v25 = vadd.f32 %v136_v23, %v96_v19 }
  0xa8   :  { %217 = vtanh.f32 %v140_v21 }
  0xa9   :  { %v141_v26 = vmul.f32 0.5, %v134_v24  ;;  %v142_v27 = vmul.f32 0.5, %v137_v25 }
  0xab   :  { %219 = vtanh.f32 %v141_v26 }
  0xac   :  { %221 = vtanh.f32 %v142_v27 }
  0xad   :  { %v216_v28 = vpop.eup %215 }
  0xae   :  { %v218_v29 = vpop.eup %217  ;;  %v147_v30 = vadd.f32 1.0, %v216_v28 }
  0xaf   :  { %v148_v31 = vadd.f32 1.0, %v218_v29 }
  0xb0   :  { %v151_v32 = vmul.f32 0.5, %v147_v30 }
  0xb1   :  { %v220_v33 = vpop.eup %219  ;;  %v152_v34 = vmul.f32 0.5, %v148_v31 }
  0xb2   :  { %v222_v35 = vpop.eup %221  ;;  %155 = vst [vmem:[#allocation10] sm:$0xff] %v151_v32  ;;  %v149_v36 = vadd.f32 1.0, %v220_v33 }
  0xb3   :  { %156 = vst [vmem:[#allocation10 + $0x8] sm:$0xff] %v152_v34  ;;  %v150_v37 = vadd.f32 1.0, %v222_v35 }
  0xb4   :  { %v153_v38 = vmul.f32 0.5, %v149_v36 }
  0xb5   :  { %v154_v39 = vmul.f32 0.5, %v150_v37 }
  0xb6   :  { %157 = vst [vmem:[#allocation10 + $0x10] sm:$0xff] %v153_v38 }
  0xb7   :  { %158 = vst [vmem:[#allocation10 + $0x18] sm:$0xff] %v154_v39 }
  0xb8   :  { %171 = dma.vmem_to_hbm [thread:$0]  %s164_s8, 512, %s166_s11, [#allocation4], %s352_s23, %s352_s23, %s353_s24  }
  0xb9   :  { %349 = dma.done.wait [#allocation4], 512  }
  0xba   :  { %350 = vsyncadd [#allocation4], 4294966784 }
  0xbb   :  { %176 = vsyncpa [#allocation3], 1 }
  0xbc   :  { %177 = vsyncpa [#allocation6], 1 }
  0xbd   :  { %178 = vsyncpa [#allocation9], 1 }
  0xbe   :  { %179 = vsyncpa [#allocation4], 1 }

</bundles_post_ra>
